<compile_context>
chip_gen: v7x
topology: tpu7x:2x2x1
jax: 0.10.0
libtpu: 0.0.40
codegen_flags: <defaults>
</compile_context>

<pallas_src>
import functools

import jax
import jax.numpy as jnp
import numpy as np
from jax import lax
from jax.experimental import pallas as pl
from jax.experimental.pallas import tpu as pltpu

_LANES = 128
_SUBLANES = 8

_BUDGET_CACHE = None


def _cdiv(a, b):
    return -(-a // b)


def _round_up(x, m):
    return _cdiv(x, m) * m


def _budget():
    """(target block bytes per stream, vmem_limit_bytes), generation aware."""
    global _BUDGET_CACHE
    if _BUDGET_CACHE is None:
        vmem = None
        try:
            vmem = int(pltpu.get_tpu_info().vmem_capacity_bytes)
        except Exception:
            vmem = None
        if vmem is not None and vmem >= 96 * 1024 * 1024:
            # v5e / v6e: 128 MiB VMEM -> 4 MiB blocks, generous scoped limit.
            _BUDGET_CACHE = (4 * 1024 * 1024, 64 * 1024 * 1024)
        else:
            # v7x (64 MiB VMEM) or unknown: 2 MiB blocks, <=48 MiB scoped.
            _BUDGET_CACHE = (2 * 1024 * 1024, 48 * 1024 * 1024)
    return _BUDGET_CACHE


def _split_2d(shape):
    """Split `shape` at a dim boundary into (rows, lanes); lanes >= 128 when
    possible.  The reshape to this 2-D view is free (no data movement)."""
    if len(shape) == 0:
        return 1, 1
    if len(shape) == 1:
        return 1, int(shape[0])
    trailing = 1
    split = len(shape)
    for i in range(len(shape) - 1, 0, -1):
        trailing *= int(shape[i])
        split = i
        if trailing >= _LANES:
            break
    leading = 1
    for d in shape[:split]:
        leading *= int(d)
    return leading, trailing


def _row_tiling(lead, trail, dtype, block_bytes):
    """Pick a row block size (multiple of 8, or full extent) for a (lead, trail)
    layout with the lane axis = full trailing extent."""
    target, vmem_limit = _budget()
    if block_bytes is not None:
        target = int(block_bytes)
    itemsize = np.dtype(dtype).itemsize
    row_bytes = _round_up(max(trail, 1), _LANES) * itemsize
    tb = max(_SUBLANES, (target // row_bytes) // _SUBLANES * _SUBLANES)
    if tb >= lead:
        tb, n_blocks = max(lead, 1), 1         # full extent -> always legal
    else:
        n_blocks = _cdiv(lead, tb)
    return tb, n_blocks, vmem_limit


# ----------------------------- Pallas kernels ------------------------------ #

def _ew_none_w_kernel(p_ref, g_ref, w_ref, o_ref, *, loss_type):
    # elementwise loss, weight folded into a single multiply on the diff
    # ((p-g)*w == p*w - g*w up to ~1 ulp); math in f32 (free under HBM bound).
    d = (p_ref[...].astype(jnp.float32) - g_ref[...].astype(jnp.float32)) \
        * w_ref[...].astype(jnp.float32)
    v = jnp.abs(d) if loss_type == "l1" else d * d
    o_ref[...] = v.astype(o_ref.dtype)


def _ew_none_nw_kernel(p_ref, g_ref, o_ref, *, loss_type):
    # elementwise loss, no target weight (no dead multiplies, no weight stream)
    d = p_ref[...].astype(jnp.float32) - g_ref[...].astype(jnp.float32)
    v = jnp.abs(d) if loss_type == "l1" else d * d
    o_ref[...] = v.astype(o_ref.dtype)


def _ew_sum_w_kernel(p_ref, g_ref, w_ref, o_ref, acc_ref,
                     *, loss_type, n_rows, tb, n_steps, need_mask):
    # Fused 'sum' reduction.  Grid = (n_par, n_steps): axis 0 is 'parallel'
    # (megacore on v7x), axis 1 is the sequential accumulation axis.
    # Per step: pure VPU adds into the f32 scratch; one cross-lane/sublane
    # reduce only at the end.
    step = pl.program_id(1)

    @pl.when(step == 0)
    def _init():
        acc_ref[...] = jnp.zeros_like(acc_ref)

    d = (p_ref[...].astype(jnp.float32) - g_ref[...].astype(jnp.float32)) \
        * w_ref[...].astype(jnp.float32)
    v = jnp.abs(d) if loss_type == "l1" else d * d
    if need_mask:
        # Mask rows past the real row count (ragged tail / over-covered grid).
        blk = pl.program_id(0) * n_steps + step      # UNclamped logical block
        row = blk * tb + lax.broadcasted_iota(jnp.int32, v.shape, 0)
        v = jnp.where(row < n_rows, v, 0.0)
    acc_ref[...] += v

    @pl.when(step == n_steps - 1)
    def _fin():
        o_ref[...] = jnp.sum(acc_ref[...], keepdims=True)


def _mpjpe_kernel(p_ref, g_ref, w_ref, o_ref, acc_ref,
                  *, true_b, tbl, n_steps, need_mask):
    # pred/gt blocks: (C, N, TBL) with the batch axis on lanes (lane-dense);
    # weight block: (N, TBL).  Usually a single grid step.
    step = pl.program_id(1)

    @pl.when(step == 0)
    def _init():
        acc_ref[...] = jnp.zeros_like(acc_ref)

    p = p_ref[...].astype(jnp.float32)                # (C, N, TBL)
    g = g_ref[...].astype(jnp.float32)
    d = p - g
    sq = jnp.sum(d * d, axis=0)                       # (N, TBL): C-1 VPU adds
    dist = jnp.sqrt(sq)                               # (N, TBL)
    w = w_ref[...].astype(jnp.float32)                # (N, TBL)
    num = jnp.sum(dist * w, axis=0, keepdims=True)    # (1, TBL)
    den = jnp.sum(w, axis=0, keepdims=True)           # (1, TBL)
    # Exact divide; NaN only if a *real* batch column has all-zero weights
    # (matches the naive reference).
    per_b = num / den
    if need_mask:
        # Lane *select* (NOT a multiply) so garbage/NaN in padded or
        # over-covered lanes never reaches the accumulator.
        blk = pl.program_id(0) * n_steps + step       # UNclamped logical block
        b_idx = blk * tbl + lax.broadcasted_iota(jnp.int32, per_b.shape, 1)
        per_b = jnp.where(b_idx < true_b, per_b, 0.0)
    acc_ref[...] += per_b                             # VPU add, per-lane

    @pl.when(step == n_steps - 1)
    def _fin():
        o_ref[...] = jnp.sum(acc_ref[...], keepdims=True)


# --------------------------- pallas_call wrappers --------------------------- #

@functools.partial(jax.jit, static_argnames=("loss_type", "block_bytes"))
def _ew_loss_none_weighted(pred3, gt3, weight, *, loss_type, block_bytes=None):
    """pred3/gt3: (B, N, C); weight broadcastable.  Elementwise loss ('none')."""
    shape = pred3.shape
    dtype = pred3.dtype
    gt3 = gt3.astype(dtype)
    w_full = jnp.broadcast_to(jnp.asarray(weight).astype(dtype), shape)

    lead, trail = _split_2d(shape)
    p2 = pred3.reshape(lead, trail)
    g2 = gt3.reshape(lead, trail)
    w2 = w_full.reshape(lead, trail)

    tb, n_blocks, vmem_limit = _row_tiling(lead, trail, dtype, block_bytes)
    numel = lead * trail
    itemsize = np.dtype(dtype).itemsize
    spec = pl.BlockSpec((tb, trail), lambda i: (i, 0))

    out = pl.pallas_call(
        functools.partial(_ew_none_w_kernel, loss_type=loss_type),
        out_shape=jax.ShapeDtypeStruct((lead, trail), dtype),
        grid=(n_blocks,),
        in_specs=[spec, spec, spec],
        out_specs=spec,
        compiler_params=pltpu.CompilerParams(
            dimension_semantics=("parallel",),
            vmem_limit_bytes=vmem_limit),
        cost_estimate=pl.CostEstimate(
            flops=int(3 * numel), transcendentals=0,
            bytes_accessed=int(4 * numel * itemsize)),
    )(p2, g2, w2)
    return out.reshape(shape)


@functools.partial(jax.jit, static_argnames=("loss_type", "block_bytes"))
def _ew_loss_none_noweight(pred, gt, *, loss_type, block_bytes=None):
    """No-weight branch: arbitrary shape, elementwise loss ('none')."""
    shape = pred.shape
    dtype = pred.dtype
    gt = gt.astype(dtype)

    lead, trail = _split_2d(shape)
    p2 = pred.reshape(lead, trail)
    g2 = gt.reshape(lead, trail)

    tb, n_blocks, vmem_limit = _row_tiling(lead, trail, dtype, block_bytes)
    numel = lead * trail
    itemsize = np.dtype(dtype).itemsize
    spec = pl.BlockSpec((tb, trail), lambda i: (i, 0))

    out = pl.pallas_call(
        functools.partial(_ew_none_nw_kernel, loss_type=loss_type),
        out_shape=jax.ShapeDtypeStruct((lead, trail), dtype),
        grid=(n_blocks,),
        in_specs=[spec, spec],
        out_specs=spec,
        compiler_params=pltpu.CompilerParams(
            dimension_semantics=("parallel",),
            vmem_limit_bytes=vmem_limit),
        cost_estimate=pl.CostEstimate(
            flops=int(2 * numel), transcendentals=0,
            bytes_accessed=int(3 * numel * itemsize)),
    )(p2, g2)
    return out.reshape(shape)


@functools.partial(jax.jit, static_argnames=("loss_type", "block_bytes"))
def _ew_loss_sum_weighted(pred3, gt3, weight, *, loss_type, block_bytes=None):
    """Fused in-kernel sum of the weighted elementwise loss -> f32 scalar."""
    shape = pred3.shape
    dtype = pred3.dtype
    gt3 = gt3.astype(dtype)
    w_full = jnp.broadcast_to(jnp.asarray(weight).astype(dtype), shape)

    lead, trail = _split_2d(shape)
    p2 = pred3.reshape(lead, trail)
    g2 = gt3.reshape(lead, trail)
    w2 = w_full.reshape(lead, trail)

    tb, n_blocks, vmem_limit = _row_tiling(lead, trail, dtype, block_bytes)
    n_par = 2 if n_blocks >= 2 else 1              # v7x: 2 TCs; loop on v5e/v6e
    n_steps = _cdiv(n_blocks, n_par)
    need_mask = (n_par * n_steps * tb != lead)

    numel = lead * trail
    itemsize = np.dtype(dtype).itemsize

    def in_map(p, i):
        # Clamp so the DMA never targets a fully out-of-range block; the kernel
        # masks using the UNclamped index, so duplicates contribute zero.
        return (jnp.minimum(p * n_steps + i, n_blocks - 1), 0)

    spec = pl.BlockSpec((tb, trail), in_map)

    out = pl.pallas_call(
        functools.partial(_ew_sum_w_kernel, loss_type=loss_type,
                          n_rows=lead, tb=tb, n_steps=n_steps,
                          need_mask=need_mask),
        out_shape=jax.ShapeDtypeStruct((n_par, 1), jnp.float32),
        grid=(n_par, n_steps),
        in_specs=[spec, spec, spec],
        out_specs=pl.BlockSpec((1, 1), lambda p, i: (p, 0)),
        scratch_shapes=[pltpu.VMEM((tb, trail), jnp.float32)],
        compiler_params=pltpu.CompilerParams(
            dimension_semantics=("parallel", "arbitrary"),
            vmem_limit_bytes=vmem_limit),
        cost_estimate=pl.CostEstimate(
            flops=int(5 * numel), transcendentals=0,
            bytes_accessed=int(3 * numel * itemsize + 8)),
    )(p2, g2, w2)
    return jnp.sum(out)   # sum the <=2 per-core partials


@functools.partial(jax.jit, static_argnames=("block_bytes",))
def _mpjpe_sum(pred3, gt3, w2d, *, block_bytes=None):
    """pred3/gt3: (B, N, C); w2d: (B, N).  Returns f32 scalar
    sum_b [ sum_n(dist_bn * w_bn) / sum_n(w_bn) ]."""
    B, N, C = pred3.shape
    gt3 = gt3.astype(pred3.dtype)
    # Lane axis = B (lane-dense); sums over C are VPU adds on the leading axis.
    p_t = jnp.transpose(pred3, (2, 1, 0))                    # (C, N, B)
    g_t = jnp.transpose(gt3, (2, 1, 0))                      # (C, N, B)
    w_t = jnp.transpose(w2d.astype(jnp.float32), (1, 0))     # (N, B)

    target, vmem_limit = _budget()
    if block_bytes is not None:
        target = int(block_bytes)
    itemsize = np.dtype(pred3.dtype).itemsize
    col_bytes = C * _round_up(N, _SUBLANES) * itemsize       # VMEM bytes / lane
    tbl = max(_LANES, (target // max(col_bytes, 1)) // _LANES * _LANES)
    if tbl >= B:
        tbl, n_blocks = B, 1                                 # single grid step
    else:
        n_blocks = _cdiv(B, tbl)
    n_par = 2 if n_blocks >= 2 else 1
    n_steps = _cdiv(n_blocks, n_par)
    need_mask = (n_par * n_steps * tbl != B)

    def kp_map(p, i):
        return (0, 0, jnp.minimum(p * n_steps + i, n_blocks - 1))

    def w_map(p, i):
        return (0, jnp.minimum(p * n_steps + i, n_blocks - 1))

    out = pl.pallas_call(
        functools.partial(_mpjpe_kernel, true_b=B, tbl=tbl,
                          n_steps=n_steps, need_mask=need_mask),
        out_shape=jax.ShapeDtypeStruct((n_par, 1), jnp.float32),
        grid=(n_par, n_steps),
        in_specs=[pl.BlockSpec((C, N, tbl), kp_map),
                  pl.BlockSpec((C, N, tbl), kp_map),
                  pl.BlockSpec((N, tbl), w_map)],
        out_specs=pl.BlockSpec((1, 1), lambda p, i: (p, 0)),
        scratch_shapes=[pltpu.VMEM((1, tbl), jnp.float32)],
        compiler_params=pltpu.CompilerParams(
            dimension_semantics=("parallel", "arbitrary"),
            vmem_limit_bytes=vmem_limit),
        cost_estimate=pl.CostEstimate(
            flops=int(B * N * (3 * C + 5)), transcendentals=int(B * N),
            bytes_accessed=int((2 * B * N * C + B * N) * itemsize + 8)),
    )(p_t, g_t, w_t)
    return jnp.sum(out)


# ------------------------------- Module port -------------------------------- #

class PerKpL1Loss:
    """JAX/Pallas port of xrmocap PerKpL1Loss (forward semantics preserved)."""

    def __init__(self, loss_type: str, reduction="none"):
        assert reduction in (None, "none", "mean", "sum")
        self.reduction = "none" if reduction is None else reduction
        self.loss_type = loss_type

    def __call__(self, pred, target, use_target_weight=False,
                 target_weight=None, num_boxes=None):
        pred = jnp.asarray(pred)
        target = jnp.asarray(target)
        if use_target_weight:
            batch_size = pred.shape[0]
            n_kps = pred.shape[1]
            pred3 = pred.reshape((batch_size, n_kps, -1))
            gt3 = target.reshape((batch_size, n_kps, -1))

            if self.loss_type in ("l1", "l2"):
                w = jnp.asarray(target_weight)
                if self.reduction == "none":
                    return _ew_loss_none_weighted(pred3, gt3, w,
                                                  loss_type=self.loss_type)
                total = _ew_loss_sum_weighted(pred3, gt3, w,
                                              loss_type=self.loss_type)
                if self.reduction == "mean":
                    total = total / (pred3.shape[0] * pred3.shape[1] *
                                     pred3.shape[2])
                return total.astype(pred3.dtype)
            elif self.loss_type == "mpjpe":
                tw = jnp.asarray(target_weight, dtype=jnp.float32)
                if tw.ndim == 3:
                    tw = tw[..., 0]                 # squeeze(-1) like reference
                w2d = jnp.broadcast_to(tw, (batch_size, n_kps))
                total = _mpjpe_sum(pred3, gt3, w2d)
                return total / num_boxes
            else:
                raise NotImplementedError
        elif self.loss_type in ("l1", "l2"):
            # reduction is forced to 'none' in this branch (matches PyTorch).
            return _ew_loss_none_noweight(pred, target,
                                          loss_type=self.loss_type)
        else:
            raise NotImplementedError


# --------------------------------- demo ------------------------------------ #

if __name__ == "__main__":
    key = jax.random.PRNGKey(0)
    ks = jax.random.split(key, 8)

    # ---- canonical module-style case: (batch, n_kps, 3), weighted ----
    B, N, C = 2, 16, 3
    pred = jax.random.normal(ks[0], (B, N, C), dtype=jnp.float32)
    target = jax.random.normal(ks[1], (B, N, C), dtype=jnp.float32)
    tw = (jax.random.uniform(ks[2], (B, N, 1)) > 0.2).astype(jnp.float32) + 0.1

    out_l1 = PerKpL1Loss("l1", "none")(pred, target, True, tw)
    jax.block_until_ready(out_l1)
    ref_l1 = jnp.abs(pred * tw - target * tw)
    np.testing.assert_allclose(np.asarray(out_l1), np.asarray(ref_l1),
                               rtol=1e-5, atol=1e-6)

    out_mean = PerKpL1Loss("l2", "mean")(pred, target, True, tw)
    jax.block_until_ready(out_mean)
    ref_mean = jnp.mean((pred * tw - target * tw) ** 2)
    np.testing.assert_allclose(np.asarray(out_mean), np.asarray(ref_mean),
                               rtol=1e-4, atol=1e-6)

    # ---- no-weight branch, arbitrary shape, reduction forced to 'none' ----
    x = jax.random.normal(ks[3], (2, 4, 16, 16), dtype=jnp.float32)
    y = jax.random.normal(ks[4], (2, 4, 16, 16), dtype=jnp.float32)
    out_l2 = PerKpL1Loss("l2", "none")(x, y, False)
    jax.block_until_ready(out_l2)
    np.testing.assert_allclose(np.asarray(out_l2), np.asarray((x - y) ** 2),
                               rtol=1e-5, atol=1e-6)

    # ---- mpjpe through the class (single-block lane-dense path) ----
    for (Bm, Nm) in [(2, 16), (200, 16)]:
        p = jax.random.normal(ks[5], (Bm, Nm, 3), dtype=jnp.float32)
        g = jax.random.normal(ks[6], (Bm, Nm, 3), dtype=jnp.float32)
        w = (jax.random.uniform(ks[7], (Bm, Nm, 1)) > 0.3).astype(jnp.float32) + 0.1
        num_boxes = 4
        out_mp = PerKpL1Loss("mpjpe")(p, g, True, w, num_boxes)
        jax.block_until_ready(out_mp)
        w2 = w[..., 0]
        dist = jnp.sqrt(jnp.sum((p - g) ** 2, axis=-1))
        ref_mp = jnp.sum(jnp.sum(dist * w2, axis=-1) /
                         jnp.sum(w2, axis=-1)) / num_boxes
        np.testing.assert_allclose(np.asarray(out_mp), np.asarray(ref_mp),
                                   rtol=1e-5, atol=1e-5)

    # ---- weighted l1 'none' + 'sum' at a modest shape (single block) ----
    Bb, Nb = 100, 500
    p = jax.random.normal(ks[0], (Bb, Nb, 3), dtype=jnp.float32)
    g = jax.random.normal(ks[1], (Bb, Nb, 3), dtype=jnp.float32)
    w = jax.random.uniform(ks[2], (Bb, Nb, 1), dtype=jnp.float32)
    out_none = PerKpL1Loss("l1", "none")(p, g, True, w)
    out_sum = PerKpL1Loss("l1", "sum")(p, g, True, w)
    jax.block_until_ready((out_none, out_sum))
    ref_none = jnp.abs(p * w - g * w)
    np.testing.assert_allclose(np.asarray(out_none), np.asarray(ref_none),
                               rtol=1e-5, atol=1e-6)
    np.testing.assert_allclose(np.asarray(out_sum),
                               np.asarray(jnp.sum(ref_none)),
                               rtol=1e-4, atol=1e-3)

    # ---- stress the multi-block / 2-way-parallel / ragged-mask code paths
    #      (what large production inputs hit) by forcing a tiny block size ----
    Bs, Ns = 100, 37
    p = jax.random.normal(ks[3], (Bs, Ns, 3), dtype=jnp.float32)
    g = jax.random.normal(ks[4], (Bs, Ns, 3), dtype=jnp.float32)
    w = jax.random.uniform(ks[5], (Bs, Ns, 1), dtype=jnp.float32)
    ref = jnp.abs(p * w - g * w)
    got_none = _ew_loss_none_weighted(p, g, w, loss_type="l1", block_bytes=4096)
    got_sum = _ew_loss_sum_weighted(p, g, w, loss_type="l1", block_bytes=4096)
    jax.block_until_ready((got_none, got_sum))
    np.testing.assert_allclose(np.asarray(got_none), np.asarray(ref),
                               rtol=1e-5, atol=1e-6)
    np.testing.assert_allclose(np.asarray(got_sum), np.asarray(jnp.sum(ref)),
                               rtol=1e-4, atol=1e-3)

    Bp, Npk = 200, 16
    p = jax.random.normal(ks[6], (Bp, Npk, 3), dtype=jnp.float32)
    g = jax.random.normal(ks[7], (Bp, Npk, 3), dtype=jnp.float32)
    w = jax.random.uniform(ks[0], (Bp, Npk), dtype=jnp.float32) + 0.05
    got_mp = _mpjpe_sum(p, g, w, block_bytes=32768)
    jax.block_until_ready(got_mp)
    dist = jnp.sqrt(jnp.sum((p - g) ** 2, axis=-1))
    ref_mp = jnp.sum(jnp.sum(dist * w, axis=-1) / jnp.sum(w, axis=-1))
    np.testing.assert_allclose(np.asarray(got_mp), np.asarray(ref_mp),
                               rtol=1e-5, atol=1e-5)

    print("KERNEL_OK")
</pallas_src>

<mosaic_0001>
module attributes {stable_mosaic.version = 11 : i64} {
  func.func @_ew_none_w_kernel(%arg0: i32, %arg1: memref<2x48xf32, #tpu.memory_space<vmem>>, %arg2: memref<2x48xf32, #tpu.memory_space<vmem>>, %arg3: memref<2x48xf32, #tpu.memory_space<vmem>>, %arg4: memref<2x48xf32, #tpu.memory_space<vmem>>) attributes {dimension_semantics = [#tpu.dimension_semantics<parallel>], iteration_bounds = array<i64: 1>, scalar_prefetch = 0 : i64, scratch_operands = 0 : i64, tpu.core_type = #tpu.core_type<tc>, window_params = [{transform_indices = @transform_0, window_bounds = array<i64: 2, 48>}, {transform_indices = @transform_1, window_bounds = array<i64: 2, 48>}, {transform_indices = @transform_2, window_bounds = array<i64: 2, 48>}, {transform_indices = @transform_3, window_bounds = array<i64: 2, 48>}]} {
    %c0 = arith.constant 0 : index
    %c0_0 = arith.constant 0 : index
    %0 = vector.load %arg1[%c0, %c0_0] : memref<2x48xf32, #tpu.memory_space<vmem>>, vector<2x48xf32>
    %c0_1 = arith.constant 0 : index
    %c0_2 = arith.constant 0 : index
    %1 = vector.load %arg2[%c0_1, %c0_2] : memref<2x48xf32, #tpu.memory_space<vmem>>, vector<2x48xf32>
    %2 = arith.subf %0, %1 : vector<2x48xf32>
    %c0_3 = arith.constant 0 : index
    %c0_4 = arith.constant 0 : index
    %3 = vector.load %arg3[%c0_3, %c0_4] : memref<2x48xf32, #tpu.memory_space<vmem>>, vector<2x48xf32>
    %4 = arith.mulf %2, %3 : vector<2x48xf32>
    %5 = math.absf %4 : vector<2x48xf32>
    %c0_5 = arith.constant 0 : index
    %c0_6 = arith.constant 0 : index
    %6 = vector.load %arg4[%c0_5, %c0_6] : memref<2x48xf32, #tpu.memory_space<vmem>>, vector<2x48xf32>
    tpu.vector_store %arg4[%c0_5, %c0_6], %5 {strides = array<i32>} : memref<2x48xf32, #tpu.memory_space<vmem>>, vector<2x48xf32>,
    return
  }
  func.func @transform_0(%arg0: i32) -> (i32, i32) {
    %c0_i32 = arith.constant 0 : i32
    %c0_i32_0 = arith.constant 0 : i32
    return %arg0, %c0_i32 : i32, i32
  }
  func.func @transform_1(%arg0: i32) -> (i32, i32) {
    %c0_i32 = arith.constant 0 : i32
    %c0_i32_0 = arith.constant 0 : i32
    return %arg0, %c0_i32 : i32, i32
  }
  func.func @transform_2(%arg0: i32) -> (i32, i32) {
    %c0_i32 = arith.constant 0 : i32
    %c0_i32_0 = arith.constant 0 : i32
    return %arg0, %c0_i32 : i32, i32
  }
  func.func @transform_3(%arg0: i32) -> (i32, i32) {
    %c0_i32 = arith.constant 0 : i32
    %c0_i32_0 = arith.constant 0 : i32
    return %arg0, %c0_i32 : i32, i32
  }
}

</mosaic_0001>

<bundles_post_ra>
// kernel: _ew_loss_none_weighted.1
= control target key start
LH: loop header
LB: loop body
LE: loop exit
PB: predicated region body
PF: predicated region fallthrough
CT: control target
= control target key end

     0   :  { %vm20_vm0 = vcmask 386048   ;;  %s58_s0 = inlined_call_operand.vmem [shape: f32[2,48], index: 0, kind: input, shape index: {}]   ;;  %s59_s1 = inlined_call_operand.vmem [shape: f32[2,48], index: 1, kind: input, shape index: {}]   ;;  %s60_s2 = inlined_call_operand.vmem [shape: f32[2,48], index: 2, kind: input, shape index: {}]   ;;  %s61_s3 = inlined_call_operand.vmem [shape: f32[2,48], index: 3, kind: output, shape index: {}]  }
   0x1   :  { %v14_v0 = vld [vmem:[%s58_s0] sm:$0x3] }
   0x2   :  { %v15_v1 = vld [vmem:[%s59_s1] sm:$0x3] }
   0x3   :  { %v17_v2 = vld [vmem:[%s60_s2] sm:$0x3]  ;;  %v16_v3 = vsub.f32 %v14_v0, %v15_v1 }
   0x5   :  { %v18_v4 = vmul.f32 %v17_v2, %v16_v3 }
   0x7   :  { %v19_v5 = vand.u32 2147483647, %v18_v4 }
   0x9   :  { %21 = vst.msk [vmem:[%s61_s3] sm:$0x3] %vm20_vm0, %v19_v5 }

</bundles_post_ra>
